<compile_context>
chip_gen: v6e
topology: v6e:2x2x1
jax: 0.10.0
libtpu: 0.0.40
codegen_flags: <defaults>
</compile_context>

<pallas_src>
import jax
import jax.numpy as jnp
from jax.experimental import pallas as pl
from jax.experimental.pallas import tpu as pltpu


def _round_up(x, m):
    return (x + m - 1) // m * m


def _mlp_kernel(x_ref, w1_ref, w2_ref, w3_ref, o_ref, acc_ref):
    # x_ref:  (tm, C)  bf16      activation tile (resident across the H axis)
    # w1_ref: (C, th)  bf16      fc_1 weight slab (in, out)
    # w2_ref: (C, th)  bf16      fc_2 weight slab (in, out)
    # w3_ref: (th, C)  bf16      c_proj weight slab (in, out)
    # o_ref:  (tm, C)  out dtype output tile (resident across the H axis)
    # acc_ref:(tm, C)  f32       VMEM accumulator scratch
    h_idx = pl.program_id(1)

    @pl.when(h_idx == 0)
    def _init():
        acc_ref[...] = jnp.zeros_like(acc_ref)

    x = x_ref[...]
    h = jnp.dot(x, w1_ref[...], preferred_element_type=jnp.float32)
    g = jnp.dot(x, w2_ref[...], preferred_element_type=jnp.float32)
    # SiLU(g) * h, fused in f32 (one live (tm, th) expression), then a single
    # bf16 cast feeding the c_proj matmul (f32 accumulation retained).
    gated = (h * (g * jax.nn.sigmoid(g))).astype(jnp.bfloat16)
    acc_ref[...] += jnp.dot(gated, w3_ref[...], preferred_element_type=jnp.float32)

    @pl.when(h_idx == pl.num_programs(1) - 1)
    def _finalize():
        o_ref[...] = acc_ref[...].astype(o_ref.dtype)


def mlp_pallas(x, w1_t, w2_t, w3_t, *, tm=256, th=512):
    """x: (B, T, C); w1_t/w2_t: (C, H); w3_t: (H, C). Returns (B, T, C)."""
    B, T, C = x.shape
    H = w1_t.shape[1]
    M = B * T
    out_dtype = x.dtype

    # Row tile: MXU-friendly, clamped for small problems (bf16-packed sublane
    # wants multiples of 16).
    tm = min(tm, _round_up(M, 16))
    # Hidden tile: must divide H (H is a multiple of 256 by module construction).
    th = min(th, H)
    if H % th != 0:
        th = 256 if H % 256 == 0 else H

    # Pad M so the grid needs no masking; padded rows are zero and discarded.
    M_pad = _round_up(M, tm)
    x2d = x.reshape(M, C)
    if M_pad != M:
        x2d = jnp.pad(x2d, ((0, M_pad - M), (0, 0)))

    # bf16 operands in, f32 accumulation inside the kernel.
    x_bf = x2d.astype(jnp.bfloat16)
    w1_bf = w1_t.astype(jnp.bfloat16)
    w2_bf = w2_t.astype(jnp.bfloat16)
    w3_bf = w3_t.astype(jnp.bfloat16)

    grid = (M_pad // tm, H // th)

    # Scoped-VMEM budget from the chosen tiles (double-buffered inputs/output +
    # f32 accumulator), with headroom; capped below v7x's 64 MiB physical VMEM.
    in_b = 2                                   # bf16
    out_b = jnp.dtype(out_dtype).itemsize
    est = (2 * tm * C * in_b                   # x tile (2 buffers)
           + 2 * 2 * C * th * in_b             # w1, w2 slabs
           + 2 * th * C * in_b                 # w3 slab
           + 2 * tm * C * out_b                # output tile
           + tm * C * 4)                       # f32 accumulator scratch
    vmem_limit = int(min(max(2 * est, 32 << 20), 60 << 20))

    cost = pl.CostEstimate(
        flops=6 * M * C * H,                   # 2*M*C*H per matmul, 3 matmuls
        transcendentals=M * H,                 # sigmoid
        bytes_accessed=(M * C * in_b + 3 * C * H * in_b + M * C * out_b),
    )

    out2d = pl.pallas_call(
        _mlp_kernel,
        out_shape=jax.ShapeDtypeStruct((M_pad, C), out_dtype),
        grid_spec=pltpu.PrefetchScalarGridSpec(
            num_scalar_prefetch=0,
            grid=grid,
            in_specs=[
                pl.BlockSpec((tm, C), lambda i, h: (i, 0)),   # x tile (h-invariant)
                pl.BlockSpec((C, th), lambda i, h: (0, h)),   # fc_1 weight slab
                pl.BlockSpec((C, th), lambda i, h: (0, h)),   # fc_2 weight slab
                pl.BlockSpec((th, C), lambda i, h: (h, 0)),   # c_proj weight slab
            ],
            out_specs=pl.BlockSpec((tm, C), lambda i, h: (i, 0)),
            scratch_shapes=[pltpu.VMEM((tm, C), jnp.float32)],
        ),
        compiler_params=pltpu.CompilerParams(
            dimension_semantics=("parallel", "arbitrary"),
            vmem_limit_bytes=vmem_limit,
        ),
        cost_estimate=cost,
    )(x_bf, w1_bf, w2_bf, w3_bf)

    return out2d[:M].reshape(B, T, C)


def mlp_reference(x, w1_t, w2_t, w3_t):
    h = x @ w1_t
    g = x @ w2_t
    return (jax.nn.silu(g) * h) @ w3_t


if __name__ == "__main__":
    # Small config: n_embd = 128 -> hidden = 256 * ceil((8*128/3)/256) = 512
    n_embd = 128
    hidden = int(8 * n_embd / 3)
    multiple_of = 256
    hidden = multiple_of * ((hidden + multiple_of - 1) // multiple_of)

    batch, seq = 2, 8

    key = jax.random.PRNGKey(0)
    kx, k1, k2, k3 = jax.random.split(key, 4)

    x = jax.random.normal(kx, (batch, seq, n_embd), dtype=jnp.float32)
    # torch Linear weights are (out, in); store transposed (in, out) for the kernel.
    w1_t = jax.random.normal(k1, (n_embd, hidden), dtype=jnp.float32) * 0.02
    w2_t = jax.random.normal(k2, (n_embd, hidden), dtype=jnp.float32) * 0.02
    w3_t = jax.random.normal(k3, (hidden, n_embd), dtype=jnp.float32) * 0.02

    out = mlp_pallas(x, w1_t, w2_t, w3_t)
    out = jax.block_until_ready(out)
    assert out.shape == (batch, seq, n_embd)

    # Reference uses the same bf16-rounded operands (kernel math is bf16 in / f32 acc).
    def bf(a):
        return a.astype(jnp.bfloat16).astype(jnp.float32)

    ref = mlp_reference(bf(x), bf(w1_t), bf(w2_t), bf(w3_t))
    assert jnp.allclose(out, ref, atol=2e-2, rtol=2e-2), "mismatch vs reference"

    print("KERNEL_OK")
</pallas_src>

<mosaic_0001>
module attributes {stable_mosaic.version = 11 : i64} {
  func.func @_mlp_kernel(%arg0: i32, %arg1: i32, %arg2: memref<16x128xbf16, #tpu.memory_space<vmem>>, %arg3: memref<128x512xbf16, #tpu.memory_space<vmem>>, %arg4: memref<128x512xbf16, #tpu.memory_space<vmem>>, %arg5: memref<512x128xbf16, #tpu.memory_space<vmem>>, %arg6: memref<16x128xf32, #tpu.memory_space<vmem>>, %arg7: memref<16x128xf32, #tpu.memory_space<vmem>>) attributes {dimension_semantics = [#tpu.dimension_semantics<parallel>, #tpu.dimension_semantics<arbitrary>], iteration_bounds = array<i64: 1, 1>, scalar_prefetch = 0 : i64, scratch_operands = 1 : i64, tpu.core_type = #tpu.core_type<tc>, window_params = [{transform_indices = @transform_0, window_bounds = array<i64: 16, 128>}, {transform_indices = @transform_1, window_bounds = array<i64: 128, 512>}, {transform_indices = @transform_2, window_bounds = array<i64: 128, 512>}, {transform_indices = @transform_3, window_bounds = array<i64: 512, 128>}, {transform_indices = @transform_4, window_bounds = array<i64: 16, 128>}]} {
    %c0_i32 = arith.constant 0 : i32
    %0 = arith.cmpi eq, %arg1, %c0_i32 : i32
    %1 = arith.extui %0 : i1 to i32
    %c0_i32_0 = arith.constant 0 : i32
    %2 = arith.cmpi ne, %1, %c0_i32_0 : i32
    scf.if %2 {
      %cst_17 = arith.constant 0.000000e+00 : f32
      %24 = vector.broadcast %cst_17 : f32 to vector<16x128xf32>
      %c0_18 = arith.constant 0 : index
      %c0_19 = arith.constant 0 : index
      %25 = vector.load %arg7[%c0_18, %c0_19] : memref<16x128xf32, #tpu.memory_space<vmem>>, vector<16x128xf32>
      tpu.vector_store %arg7[%c0_18, %c0_19], %24 {strides = array<i32>} : memref<16x128xf32, #tpu.memory_space<vmem>>, vector<16x128xf32>,
    } else {
    }
    %c0 = arith.constant 0 : index
    %c0_1 = arith.constant 0 : index
    %3 = vector.load %arg2[%c0, %c0_1] : memref<16x128xbf16, #tpu.memory_space<vmem>>, vector<16x128xbf16>
    %c0_2 = arith.constant 0 : index
    %c0_3 = arith.constant 0 : index
    %4 = vector.load %arg3[%c0_2, %c0_3] : memref<128x512xbf16, #tpu.memory_space<vmem>>, vector<128x512xbf16>
    %cst = arith.constant dense<0.000000e+00> : vector<16x512xf32>
    %5 = tpu.matmul %3, %4, %cst {dimension_numbers = #tpu.dot_dimension_numbers<[1], [0], [0], [1], [0, 0, 1, 1], [], []>} : vector<16x128xbf16>, vector<128x512xbf16>, vector<16x512xf32> -> vector<16x512xf32>
    %c0_4 = arith.constant 0 : index
    %c0_5 = arith.constant 0 : index
    %6 = vector.load %arg4[%c0_4, %c0_5] : memref<128x512xbf16, #tpu.memory_space<vmem>>, vector<128x512xbf16>
    %cst_6 = arith.constant dense<0.000000e+00> : vector<16x512xf32>
    %7 = tpu.matmul %3, %6, %cst_6 {dimension_numbers = #tpu.dot_dimension_numbers<[1], [0], [0], [1], [0, 0, 1, 1], [], []>} : vector<16x128xbf16>, vector<128x512xbf16>, vector<16x512xf32> -> vector<16x512xf32>
    %8 = arith.negf %7 : vector<16x512xf32>
    %9 = math.exp %8 : vector<16x512xf32>
    %cst_7 = arith.constant 1.000000e+00 : f32
    %10 = vector.broadcast %cst_7 : f32 to vector<16x512xf32>
    %11 = arith.addf %10, %9 : vector<16x512xf32>
    %12 = arith.divf %10, %11 : vector<16x512xf32>
    %13 = arith.mulf %7, %12 : vector<16x512xf32>
    %14 = arith.mulf %5, %13 : vector<16x512xf32>
    %15 = arith.truncf %14 : vector<16x512xf32> to vector<16x512xbf16>
    %c0_8 = arith.constant 0 : index
    %c0_9 = arith.constant 0 : index
    %16 = vector.load %arg7[%c0_8, %c0_9] : memref<16x128xf32, #tpu.memory_space<vmem>>, vector<16x128xf32>
    %c0_10 = arith.constant 0 : index
    %c0_11 = arith.constant 0 : index
    %17 = vector.load %arg5[%c0_10, %c0_11] : memref<512x128xbf16, #tpu.memory_space<vmem>>, vector<512x128xbf16>
    %cst_12 = arith.constant dense<0.000000e+00> : vector<16x128xf32>
    %18 = tpu.matmul %15, %17, %cst_12 {dimension_numbers = #tpu.dot_dimension_numbers<[1], [0], [0], [1], [0, 0, 1, 1], [], []>} : vector<16x512xbf16>, vector<512x128xbf16>, vector<16x128xf32> -> vector<16x128xf32>
    %19 = arith.addf %16, %18 : vector<16x128xf32>
    %c0_13 = arith.constant 0 : index
    %c0_14 = arith.constant 0 : index
    %20 = vector.load %arg7[%c0_13, %c0_14] : memref<16x128xf32, #tpu.memory_space<vmem>>, vector<16x128xf32>
    tpu.vector_store %arg7[%c0_13, %c0_14], %19 {strides = array<i32>} : memref<16x128xf32, #tpu.memory_space<vmem>>, vector<16x128xf32>,
    %c0_i32_15 = arith.constant 0 : i32
    %21 = arith.cmpi eq, %arg1, %c0_i32_15 : i32
    %22 = arith.extui %21 : i1 to i32
    %c0_i32_16 = arith.constant 0 : i32
    %23 = arith.cmpi ne, %22, %c0_i32_16 : i32
    scf.if %23 {
      %c0_17 = arith.constant 0 : index
      %c0_18 = arith.constant 0 : index
      %24 = vector.load %arg7[%c0_17, %c0_18] : memref<16x128xf32, #tpu.memory_space<vmem>>, vector<16x128xf32>
      %c0_19 = arith.constant 0 : index
      %c0_20 = arith.constant 0 : index
      %25 = vector.load %arg6[%c0_19, %c0_20] : memref<16x128xf32, #tpu.memory_space<vmem>>, vector<16x128xf32>
      tpu.vector_store %arg6[%c0_19, %c0_20], %24 {strides = array<i32>} : memref<16x128xf32, #tpu.memory_space<vmem>>, vector<16x128xf32>,
    } else {
    }
    return
  }
  func.func @transform_0(%arg0: i32, %arg1: i32) -> (i32, i32) {
    %c0_i32 = arith.constant 0 : i32
    %c0_i32_0 = arith.constant 0 : i32
    return %arg0, %c0_i32 : i32, i32
  }
  func.func @transform_1(%arg0: i32, %arg1: i32) -> (i32, i32) {
    %c0_i32 = arith.constant 0 : i32
    %c0_i32_0 = arith.constant 0 : i32
    return %c0_i32, %arg1 : i32, i32
  }
  func.func @transform_2(%arg0: i32, %arg1: i32) -> (i32, i32) {
    %c0_i32 = arith.constant 0 : i32
    %c0_i32_0 = arith.constant 0 : i32
    return %c0_i32, %arg1 : i32, i32
  }
  func.func @transform_3(%arg0: i32, %arg1: i32) -> (i32, i32) {
    %c0_i32 = arith.constant 0 : i32
    %c0_i32_0 = arith.constant 0 : i32
    return %arg1, %c0_i32 : i32, i32
  }
  func.func @transform_4(%arg0: i32, %arg1: i32) -> (i32, i32) {
    %c0_i32 = arith.constant 0 : i32
    %c0_i32_0 = arith.constant 0 : i32
    return %arg0, %c0_i32 : i32, i32
  }
}

</mosaic_0001>

<bundles_post_ra>
// kernel: tpu_custom_call.1
= control target key start
LH: loop header
LB: loop body
LE: loop exit
PB: predicated region body
PF: predicated region fallthrough
CT: control target
= control target key end

     0   :  { %9 = vsyncpa [#allocation4], 0  ;;  %s1604_s0 = inlined_call_operand.hbm [shape: bf16[16,128], index: 0, kind: input, shape index: {}]   ;;  %s1605_s1 = inlined_call_operand.hbm [shape: bf16[128,512], index: 1, kind: input, shape index: {}]   ;;  %s1606_s2 = inlined_call_operand.hbm [shape: bf16[128,512], index: 2, kind: input, shape index: {}]   ;;  %s1607_s3 = inlined_call_operand.hbm [shape: bf16[512,128], index: 3, kind: input, shape index: {}]   ;;  %s1608_s4 = inlined_call_operand.hbm [shape: f32[16,128], index: 4, kind: output, shape index: {}]  }
   0x1   :  { %10 = vsyncpa [#allocation7], 0 }
   0x2   :  { %11 = vsyncpa [#allocation10], 0 }
   0x3   :  { %12 = vsyncpa [#allocation5], 0  ;;  %s1512_s15 = smov [#allocation6]  }
   0x4   :  { %s30_s16 = sshll.u32 %s1512_s15, 4  ;;  %s31_s16 = int_to_ptr.vmem [resolvable:$true] %s30_s16 }
   0x5   :  { %s1412_s17 = scalar_lea.vmem %s31_s16, 4096  ;;  %p1417_p1 = scmp.lt.s32.totalorder %s31_s16, %s31_s16 }
   0x6   :  { %p1413_p0 = scmp.ne.s32.totalorder %s31_s16, %s1412_s17  ;;  %p1418_p2 = scmp.lt.s32.totalorder %s1412_s17, %s1412_s17 }
   0x8   :  { %p1419_p3 = por %p1418_p2, %p1417_p1 }
   0xa   :  { %p1420_p4 = pnand %p1419_p3, %p1413_p0 }
   0xc   :  { %1423 = shalt.err (!%p1420_p4)
}
   0xd   :  { %s1513_s18 = smov 256   ;;  %s1514_s19 = smov 16  }
   0xe   :  { %36 = dma.hbm_to_vmem [thread:$0]  %s1605_s1, 4096, %s31_s16, [#allocation7], %s1513_s18, %s1513_s18, %s1514_s19  }
   0xf   :  { %s1515_s22 = smov [#allocation3]  }
  0x10   :  { %s18_s23 = sshll.u32 %s1515_s22, 4  ;;  %s19_s23 = int_to_ptr.vmem [resolvable:$true] %s18_s23 }
  0x11   :  { %s1432_s24 = scalar_lea.vmem %s19_s23, 128  ;;  %p1437_p6 = scmp.lt.s32.totalorder %s19_s23, %s19_s23 }
  0x12   :  { %p1433_p5 = scmp.ne.s32.totalorder %s19_s23, %s1432_s24  ;;  %p1438_p7 = scmp.lt.s32.totalorder %s1432_s24, %s1432_s24 }
  0x14   :  { %p1439_p8 = por %p1438_p7, %p1437_p6 }
  0x16   :  { %p1440_p9 = pnand %p1439_p8, %p1433_p5 }
  0x18   :  { %1443 = shalt.err (!%p1440_p9)
}
  0x19   :  { %s1516_s25 = smov 64   ;;  %s1517_s26 = smov 4  }
  0x1a   :  { %24 = dma.hbm_to_vmem [thread:$0]  %s1604_s0, 128, %s19_s23, [#allocation4], %s1516_s25, %s1516_s25, %s1517_s26  }
  0x1b   :  { %s1518_s29 = smov [#allocation8]   ;;  %s1519_s5 = smov [#allocation9]  }
  0x1c   :  { %s42_s30 = sshll.u32 %s1518_s29, 4  ;;  %s54_s1 = sshll.u32 %s1519_s5, 4  ;;  %s43_s30 = int_to_ptr.vmem [resolvable:$true] %s42_s30  ;;  %s55_s1 = int_to_ptr.vmem [resolvable:$true] %s54_s1 }
  0x1d   :  { %s1452_s6 = scalar_lea.vmem %s43_s30, 4096  ;;  %p1457_p11 = scmp.lt.s32.totalorder %s43_s30, %s43_s30 }
  0x1e   :  { %p1453_p10 = scmp.ne.s32.totalorder %s43_s30, %s1452_s6  ;;  %p1458_p12 = scmp.lt.s32.totalorder %s1452_s6, %s1452_s6 }
  0x20   :  { %p1459_p13 = por %p1458_p12, %p1457_p11 }
  0x22   :  { %p1460_p0 = pnand %p1459_p13, %p1453_p10 }
  0x24   :  { %1463 = shalt.err (!%p1460_p0)
}
  0x25   :  { %48 = dma.hbm_to_vmem [thread:$0]  %s1606_s2, 4096, %s43_s30, [#allocation7], %s1513_s18, %s1513_s18, %s1514_s19  }
  0x26   :  { %s1472_s0 = scalar_lea.vmem %s55_s1, 4096  ;;  %p1477_p2 = scmp.lt.s32.totalorder %s55_s1, %s55_s1 }
  0x27   :  { %p1473_p1 = scmp.ne.s32.totalorder %s55_s1, %s1472_s0  ;;  %p1478_p3 = scmp.lt.s32.totalorder %s1472_s0, %s1472_s0 }
  0x29   :  { %p1479_p4 = por %p1478_p3, %p1477_p2 }
  0x2b   :  { %p1480_p5 = pnand %p1479_p4, %p1473_p1 }
  0x2d   :  { %1483 = shalt.err (!%p1480_p5)
}
  0x2e   :  { %60 = dma.hbm_to_vmem [thread:$0]  %s1607_s3, 4096, %s55_s1, [#allocation10], %s1516_s25, %s1516_s25, %s1517_s26  }
  0x2f   :  { %1504 = dma.done.wait [#allocation4], 128  }
  0x30   :  { %1505 = vsyncadd [#allocation4], 4294967168 }
  0x31   :  { %1506 = dma.done.wait [#allocation7], 8192  }
  0x32   :  { %1507 = vsyncadd [#allocation7], 4294959104 }
  0x33   :  { %1508 = dma.done.wait [#allocation10], 4096  }
  0x34   :  { %1509 = vsyncadd [#allocation10], 4294963200  ;;  %v1520_v0 = vmov 0   ;;  %v1243_v1 = vld [vmem:[#allocation6 + $0xe4] ss:$16 sps:$4 sm:$0xff]   ;;  %v1569_v35 = vld [vmem:[#allocation3] sm:$0xff]  }
  0x35   :  { %312 = vmatprep.mubr.bf16.mxu0 %v1520_v0  ;;  %355 = vmatprep.mubr.bf16.mxu1 %v1520_v0  ;;  %v1245_v2 = vld [vmem:[#allocation6 + $0xec] ss:$16 sps:$4 sm:$0xff]   ;;  %v1247_v3 = vld [vmem:[#allocation6 + $0xe0] ss:$16 sps:$4 sm:$0xff]   ;;  %v1248_v4 = vld [vmem:[#allocation6 + $0xe8] ss:$16 sps:$4 sm:$0xff]  }
  0x36   :  { %280 = vmatprep.subr.bf16.mxu0 %v1243_v1  ;;  %323 = vmatprep.subr.bf16.mxu1 %v1245_v2  ;;  %v1249_v5 = vld [vmem:[#allocation6 + $0xc4] ss:$16 sps:$4 sm:$0xff]   ;;  %v1251_v6 = vld [vmem:[#allocation6 + $0xcc] ss:$16 sps:$4 sm:$0xff]   ;;  %v1253_v7 = vld [vmem:[#allocation6 + $0xc0] ss:$16 sps:$4 sm:$0xff]  }
  0x37   :  { %281 = vmatpush1.bf16.msra.mxu0 %v1247_v3  ;;  %324 = vmatpush1.bf16.msra.mxu1 %v1248_v4  ;;  %v1254_v8 = vld [vmem:[#allocation6 + $0xc8] ss:$16 sps:$4 sm:$0xff]   ;;  %v1255_v9 = vld [vmem:[#allocation6 + $0xa4] ss:$16 sps:$4 sm:$0xff]   ;;  %v1257_v10 = vld [vmem:[#allocation6 + $0xac] ss:$16 sps:$4 sm:$0xff]  }
  0x38   :  { %282 = vmatprep.subr.bf16.mxu0 %v1249_v5  ;;  %325 = vmatprep.subr.bf16.mxu1 %v1251_v6  ;;  %v1259_v11 = vld [vmem:[#allocation6 + $0xa0] ss:$16 sps:$4 sm:$0xff]   ;;  %v1260_v12 = vld [vmem:[#allocation6 + $0xa8] ss:$16 sps:$4 sm:$0xff]   ;;  %v1261_v13 = vld [vmem:[#allocation6 + $0x84] ss:$16 sps:$4 sm:$0xff]  }
  0x39   :  { %v1263_v14 = vld [vmem:[#allocation6 + $0x8c] ss:$16 sps:$4 sm:$0xff]   ;;  %v1265_v15 = vld [vmem:[#allocation6 + $0x80] ss:$16 sps:$4 sm:$0xff]   ;;  %v1266_v16 = vld [vmem:[#allocation6 + $0x88] ss:$16 sps:$4 sm:$0xff]  }
  0x3a   :  { %v1267_v17 = vld [vmem:[#allocation6 + $0x64] ss:$16 sps:$4 sm:$0xff]   ;;  %v1269_v18 = vld [vmem:[#allocation6 + $0x6c] ss:$16 sps:$4 sm:$0xff]   ;;  %v1271_v19 = vld [vmem:[#allocation6 + $0x60] ss:$16 sps:$4 sm:$0xff]  }
  0x3b   :  { %283 = vmatpush1.bf16.msra.mxu0 %v1253_v7  ;;  %326 = vmatpush1.bf16.msra.mxu1 %v1254_v8  ;;  %v1272_v20 = vld [vmem:[#allocation6 + $0x68] ss:$16 sps:$4 sm:$0xff]   ;;  %v1273_v21 = vld [vmem:[#allocation6 + $0x44] ss:$16 sps:$4 sm:$0xff]   ;;  %v1275_v22 = vld [vmem:[#allocation6 + $0x4c] ss:$16 sps:$4 sm:$0xff]  }
  0x3c   :  { %284 = vmatprep.subr.bf16.mxu0 %v1255_v9  ;;  %327 = vmatprep.subr.bf16.mxu1 %v1257_v10  ;;  %v1277_v23 = vld [vmem:[#allocation6 + $0x40] ss:$16 sps:$4 sm:$0xff]   ;;  %v1278_v24 = vld [vmem:[#allocation6 + $0x48] ss:$16 sps:$4 sm:$0xff]   ;;  %v1279_v25 = vld [vmem:[#allocation6 + $0x24] ss:$16 sps:$4 sm:$0xff]  }
  0x3d   :  { %v1281_v26 = vld [vmem:[#allocation6 + $0x2c] ss:$16 sps:$4 sm:$0xff]   ;;  %v1283_v27 = vld [vmem:[#allocation6 + $0x20] ss:$16 sps:$4 sm:$0xff]   ;;  %v1284_v28 = vld [vmem:[#allocation6 + $0x28] ss:$16 sps:$4 sm:$0xff]  }
  0x3e   :  { %v1285_v29 = vld [vmem:[#allocation6 + $0x4] ss:$16 sps:$4 sm:$0xff]   ;;  %v1287_v30 = vld [vmem:[#allocation6 + $0xc] ss:$16 sps:$4 sm:$0xff]   ;;  %v1289_v31 = vld [vmem:[#allocation6] ss:$16 sps:$4 sm:$0xff]  }
  0x3f   :  { %285 = vmatpush1.bf16.msra.mxu0 %v1259_v11  ;;  %328 = vmatpush1.bf16.msra.mxu1 %v1260_v12  ;;  %v1290_v32 = vld [vmem:[#allocation6 + $0x8] ss:$16 sps:$4 sm:$0xff]   ;;  %v1294_v33 = vld [vmem:[#allocation8 + $0xe4] ss:$16 sps:$4 sm:$0xff]   ;;  %v1297_v34 = vld [vmem:[#allocation8 + $0xec] ss:$16 sps:$4 sm:$0xff]  }
  0x40   :  { %286 = vmatprep.subr.bf16.mxu0 %v1261_v13  ;;  %329 = vmatprep.subr.bf16.mxu1 %v1263_v14  ;;  %v1292_v36 = vld [vmem:[#allocation8 + $0xe0] ss:$16 sps:$4 sm:$0xff]   ;;  %v1295_v37 = vld [vmem:[#allocation8 + $0xe8] ss:$16 sps:$4 sm:$0xff]   ;;  %v1300_v38 = vld [vmem:[#allocation8 + $0xc4] ss:$16 sps:$4 sm:$0xff]  }
  0x41   :  { %v1303_v39 = vld [vmem:[#allocation8 + $0xcc] ss:$16 sps:$4 sm:$0xff]   ;;  %v1298_v40 = vld [vmem:[#allocation8 + $0xc0] ss:$16 sps:$4 sm:$0xff]   ;;  %v1301_v41 = vld [vmem:[#allocation8 + $0xc8] ss:$16 sps:$4 sm:$0xff]  }
  0x42   :  { %v1306_v42 = vld [vmem:[#allocation8 + $0xa4] ss:$16 sps:$4 sm:$0xff]   ;;  %v1309_v43 = vld [vmem:[#allocation8 + $0xac] ss:$16 sps:$4 sm:$0xff]   ;;  %v1304_v44 = vld [vmem:[#allocation8 + $0xa0] ss:$16 sps:$4 sm:$0xff]  }
  0x43   :  { %287 = vmatpush1.bf16.msra.mxu0 %v1265_v15  ;;  %330 = vmatpush1.bf16.msra.mxu1 %v1266_v16  ;;  %v1307_v45 = vld [vmem:[#allocation8 + $0xa8] ss:$16 sps:$4 sm:$0xff]   ;;  %v1312_v46 = vld [vmem:[#allocation8 + $0x84] ss:$16 sps:$4 sm:$0xff]   ;;  %v1315_v47 = vld [vmem:[#allocation8 + $0x8c] ss:$16 sps:$4 sm:$0xff]  }
  0x44   :  { %288 = vmatprep.subr.bf16.mxu0 %v1267_v17  ;;  %331 = vmatprep.subr.bf16.mxu1 %v1269_v18  ;;  %v1310_v48 = vld [vmem:[#allocation8 + $0x80] ss:$16 sps:$4 sm:$0xff]   ;;  %v1313_v49 = vld [vmem:[#allocation8 + $0x88] ss:$16 sps:$4 sm:$0xff]   ;;  %v1318_v50 = vld [vmem:[#allocation8 + $0x64] ss:$16 sps:$4 sm:$0xff]  }
  0x45   :  { %v1321_v51 = vld [vmem:[#allocation8 + $0x6c] ss:$16 sps:$4 sm:$0xff]   ;;  %v1316_v52 = vld [vmem:[#allocation8 + $0x60] ss:$16 sps:$4 sm:$0xff]   ;;  %v1319_v53 = vld [vmem:[#allocation8 + $0x68] ss:$16 sps:$4 sm:$0xff]  }
  0x46   :  { %v1324_v54 = vld [vmem:[#allocation8 + $0x44] ss:$16 sps:$4 sm:$0xff]   ;;  %v1327_v55 = vld [vmem:[#allocation8 + $0x4c] ss:$16 sps:$4 sm:$0xff]   ;;  %v1322_v56 = vld [vmem:[#allocation8 + $0x40] ss:$16 sps:$4 sm:$0xff]  }
  0x47   :  { %289 = vmatpush1.bf16.msra.mxu0 %v1271_v19  ;;  %332 = vmatpush1.bf16.msra.mxu1 %v1272_v20  ;;  %v1325_v57 = vld [vmem:[#allocation8 + $0x48] ss:$16 sps:$4 sm:$0xff]   ;;  %v1330_v58 = vld [vmem:[#allocation8 + $0x24] ss:$16 sps:$4 sm:$0xff]   ;;  %v1333_v59 = vld [vmem:[#allocation8 + $0x2c] ss:$16 sps:$4 sm:$0xff]  }
  0x48   :  { %290 = vmatprep.subr.bf16.mxu0 %v1273_v21  ;;  %333 = vmatprep.subr.bf16.mxu1 %v1275_v22  ;;  %v1328_v60 = vld [vmem:[#allocation8 + $0x20] ss:$16 sps:$4 sm:$0xff]   ;;  %v1331_v61 = vld [vmem:[#allocation8 + $0x28] ss:$16 sps:$4 sm:$0xff]   ;;  %v1336_v62 = vld [vmem:[#allocation8 + $0x4] ss:$16 sps:$4 sm:$0xff]  }
  0x49   :  { %v1339_v63 = vld [vmem:[#allocation8 + $0xc] ss:$16 sps:$4 sm:$0xff]   ;;  %v1337_v1 = vld [vmem:[#allocation8 + $0x8] ss:$16 sps:$4 sm:$0xff]   ;;  %v1344_v6 = vld [vmem:[#allocation9 + $0x70] sm:$0xff]   ;;  %s1521_s2 = smov [#allocation11]  }
  0x4a   :  { %v1340_v2 = vld [vmem:[#allocation9 + $0x78] sm:$0xff]   ;;  %v1345_v7 = vld [vmem:[#allocation9 + $0xf0] sm:$0xff]   ;;  %v1348_v10 = vld [vmem:[#allocation9 + $0x68] sm:$0xff]   ;;  %s1068_s3 = sshll.u32 %s1521_s2, 4  ;;  %s1069_s3 = int_to_ptr.vmem [resolvable:$true] %s1068_s3 }
  0x4b   :  { %291 = vmatpush1.bf16.msra.mxu0 %v1277_v23  ;;  %334 = vmatpush1.bf16.msra.mxu1 %v1278_v24  ;;  %v1341_v3 = vld [vmem:[#allocation9 + $0xf8] sm:$0xff]   ;;  %v1346_v8 = vld [vmem:[#allocation9 + $0x30] sm:$0xff]   ;;  %v1349_v11 = vld [vmem:[#allocation9 + $0xe8] sm:$0xff]   ;;  %s1484_s11 = scalar_lea.vmem %s1069_s3, 256  ;;  %p1489_p7 = scmp.lt.s32.totalorder %s1069_s3, %s1069_s3 }
  0x4c   :  { %292 = vmatprep.subr.bf16.mxu0 %v1279_v25  ;;  %335 = vmatprep.subr.bf16.mxu1 %v1281_v26  ;;  %v1342_v4 = vld [vmem:[#allocation9 + $0x38] sm:$0xff]   ;;  %v1347_v9 = vld [vmem:[#allocation9 + $0xb0] sm:$0xff]   ;;  %v1350_v12 = vld [vmem:[#allocation9 + $0x28] sm:$0xff]   ;;  %p1485_p6 = scmp.ne.s32.totalorder %s1069_s3, %s1484_s11  ;;  %p1490_p8 = scmp.lt.s32.totalorder %s1484_s11, %s1484_s11 }
  0x4d   :  { %v1343_v5 = vld [vmem:[#allocation9 + $0xb8] sm:$0xff]   ;;  %v1351_v13 = vld [vmem:[#allocation9 + $0xa8] sm:$0xff]   ;;  %v1352_v14 = vld [vmem:[#allocation9 + $0x60] sm:$0xff]  }
  0x4e   :  { %v1353_v15 = vld [vmem:[#allocation9 + $0xe0] sm:$0xff]   ;;  %v1356_v18 = vld [vmem:[#allocation9 + $0x58] sm:$0xff]   ;;  %v1360_v22 = vld [vmem:[#allocation9 + $0x50] sm:$0xff]   ;;  %p1491_p9 = por %p1490_p8, %p1489_p7 }
  0x4f   :  { %293 = vmatpush1.bf16.msra.mxu0 %v1283_v27  ;;  %336 = vmatpush1.bf16.msra.mxu1 %v1284_v28  ;;  %v1354_v16 = vld [vmem:[#allocation9 + $0x20] sm:$0xff]   ;;  %v1357_v19 = vld [vmem:[#allocation9 + $0xd8] sm:$0xff]   ;;  %v1361_v23 = vld [vmem:[#allocation9 + $0xd0] sm:$0xff]  }
  0x50   :  { %294 = vmatprep.subr.bf16.mxu0 %v1285_v29  ;;  %337 = vmatprep.subr.bf16.mxu1 %v1287_v30  ;;  %v1355_v17 = vld [vmem:[#allocation9 + $0xa0] sm:$0xff]   ;;  %v1358_v20 = vld [vmem:[#allocation9 + $0x18] sm:$0xff]   ;;  %v1362_v24 = vld [vmem:[#allocation9 + $0x10] sm:$0xff]   ;;  %p1492_p10 = pnand %p1491_p9, %p1485_p6 }
  0x51   :  { %v1359_v21 = vld [vmem:[#allocation9 + $0x98] sm:$0xff]   ;;  %v1363_v25 = vld [vmem:[#allocation9 + $0x90] sm:$0xff]   ;;  %v1364_v26 = vld [vmem:[#allocation9 + $0x48] sm:$0xff]  }
  0x52   :  { %v1365_v27 = vld [vmem:[#allocation9 + $0xc8] sm:$0xff]   ;;  %v1368_v30 = vld [vmem:[#allocation9 + $0x40] sm:$0xff]  }
  0x53   :  { %295 = vmatpush1.bf16.msra.mxu0 %v1289_v31  ;;  %338 = vmatpush1.bf16.msra.mxu1 %v1290_v32  ;;  %v1366_v28 = vld [vmem:[#allocation9 + $0x8] sm:$0xff]   ;;  %v1369_v31 = vld [vmem:[#allocation9 + $0xc0] sm:$0xff]  }
  0x54   :  { %558 = vmatprep.subr.bf16.mxu0 %v1294_v33  ;;  %601 = vmatprep.subr.bf16.mxu1 %v1297_v34  ;;  %v1367_v29 = vld [vmem:[#allocation9 + $0x88] sm:$0xff]   ;;  %v1370_v32 = vld [vmem:[#allocation9] sm:$0xff]  }
  0x55   :  { %v1371_v33 = vld [vmem:[#allocation9 + $0x80] sm:$0xff]  }
  0x56   :  { %313 = vmatmul.mubr.bf16.vlgmr.msra.gmra.mxu0 %v1569_v35  ;;  %356 = vmatmul.mubr.bf16.vlgmr.msra.gmra.mxu1 %v1569_v35 }
  0x57   :  { %559 = vmatpush1.bf16.msra.mxu0 %v1292_v36  ;;  %602 = vmatpush1.bf16.msra.mxu1 %v1295_v37 }
  0x58   :  { %560 = vmatprep.subr.bf16.mxu0 %v1300_v38  ;;  %603 = vmatprep.subr.bf16.mxu1 %v1303_v39 }
  0x59   :  { %590 = vmatprep.mubr.bf16.mxu0 %v1520_v0  ;;  %633 = vmatprep.mubr.bf16.mxu1 %v1520_v0  ;;  %v1334_v0 = vld [vmem:[#allocation8] ss:$16 sps:$4 sm:$0xff]  }
  0x5b   :  { %561 = vmatpush1.bf16.msra.mxu0 %v1298_v40  ;;  %604 = vmatpush1.bf16.msra.mxu1 %v1301_v41 }
  0x5c   :  { %562 = vmatprep.subr.bf16.mxu0 %v1306_v42  ;;  %605 = vmatprep.subr.bf16.mxu1 %v1309_v43 }
  0x5f   :  { %563 = vmatpush1.bf16.msra.mxu0 %v1304_v44  ;;  %606 = vmatpush1.bf16.msra.mxu1 %v1307_v45 }
  0x60   :  { %564 = vmatprep.subr.bf16.mxu0 %v1312_v46  ;;  %607 = vmatprep.subr.bf16.mxu1 %v1315_v47 }
  0x63   :  { %565 = vmatpush1.bf16.msra.mxu0 %v1310_v48  ;;  %608 = vmatpush1.bf16.msra.mxu1 %v1313_v49 }
  0x64   :  { %566 = vmatprep.subr.bf16.mxu0 %v1318_v50  ;;  %609 = vmatprep.subr.bf16.mxu1 %v1321_v51 }
  0x67   :  { %567 = vmatpush1.bf16.msra.mxu0 %v1316_v52  ;;  %610 = vmatpush1.bf16.msra.mxu1 %v1319_v53 }
  0x68   :  { %568 = vmatprep.subr.bf16.mxu0 %v1324_v54  ;;  %611 = vmatprep.subr.bf16.mxu1 %v1327_v55 }
  0x6b   :  { %569 = vmatpush1.bf16.msra.mxu0 %v1322_v56  ;;  %612 = vmatpush1.bf16.msra.mxu1 %v1325_v57 }
  0x6c   :  { %570 = vmatprep.subr.bf16.mxu0 %v1330_v58  ;;  %613 = vmatprep.subr.bf16.mxu1 %v1333_v59 }
  0x6f   :  { %571 = vmatpush1.bf16.msra.mxu0 %v1328_v60  ;;  %614 = vmatpush1.bf16.msra.mxu1 %v1331_v61 }
  0x70   :  { %572 = vmatprep.subr.bf16.mxu0 %v1336_v62  ;;  %615 = vmatprep.subr.bf16.mxu1 %v1339_v63 }
  0x73   :  { %573 = vmatpush1.bf16.msra.mxu0 %v1334_v0  ;;  %616 = vmatpush1.bf16.msra.mxu1 %v1337_v1 }
  0x74   :  { %1187 = vmatprep.subr.bf16.mxu0 %v1340_v2  ;;  %1209 = vmatprep.subr.bf16.mxu1 %v1341_v3 }
  0x76   :  { %591 = vmatmul.mubr.bf16.vlgmr.msra.gmra.mxu0 %v1569_v35  ;;  %634 = vmatmul.mubr.bf16.vlgmr.msra.gmra.mxu1 %v1569_v35 }
  0x77   :  { %1188 = vmatpush3.bf16.msra.mxu0 %v1342_v4  ;;  %1210 = vmatpush3.bf16.msra.mxu1 %v1343_v5 }
  0x78   :  { %1189 = vmatprep.subr.bf16.mxu0 %v1344_v6  ;;  %1211 = vmatprep.subr.bf16.mxu1 %v1345_v7 }
  0x7b   :  { %1190 = vmatpush3.bf16.msra.mxu0 %v1346_v8  ;;  %1212 = vmatpush3.bf16.msra.mxu1 %v1347_v9 }
  0x7c   :  { %1191 = vmatprep.subr.bf16.mxu0 %v1348_v10  ;;  %1213 = vmatprep.subr.bf16.mxu1 %v1349_v11 }
  0x7f   :  { %1192 = vmatpush3.bf16.msra.mxu0 %v1350_v12  ;;  %1214 = vmatpush3.bf16.msra.mxu1 %v1351_v13 }
  0x80   :  { %1193 = vmatprep.subr.bf16.mxu0 %v1352_v14  ;;  %1215 = vmatprep.subr.bf16.mxu1 %v1353_v15 }
  0x83   :  { %1194 = vmatpush3.bf16.msra.mxu0 %v1354_v16  ;;  %1216 = vmatpush3.bf16.msra.mxu1 %v1355_v17 }
  0x84   :  { %1195 = vmatprep.subr.bf16.mxu0 %v1356_v18  ;;  %1217 = vmatprep.subr.bf16.mxu1 %v1357_v19 }
  0x87   :  { %1196 = vmatpush3.bf16.msra.mxu0 %v1358_v20  ;;  %1218 = vmatpush3.bf16.msra.mxu1 %v1359_v21 }
  0x88   :  { %1197 = vmatprep.subr.bf16.mxu0 %v1360_v22  ;;  %1219 = vmatprep.subr.bf16.mxu1 %v1361_v23 }
  0x8b   :  { %1198 = vmatpush3.bf16.msra.mxu0 %v1362_v24  ;;  %1220 = vmatpush3.bf16.msra.mxu1 %v1363_v25 }
  0x8c   :  { %1199 = vmatprep.subr.bf16.mxu0 %v1364_v26  ;;  %1221 = vmatprep.subr.bf16.mxu1 %v1365_v27 }
  0x8f   :  { %1200 = vmatpush3.bf16.msra.mxu0 %v1366_v28  ;;  %1222 = vmatpush3.bf16.msra.mxu1 %v1367_v29 }
  0x90   :  { %1201 = vmatprep.subr.bf16.mxu0 %v1368_v30  ;;  %1223 = vmatprep.subr.bf16.mxu1 %v1369_v31 }
  0x93   :  { %1202 = vmatpush3.bf16.msra.mxu0 %v1370_v32  ;;  %1224 = vmatpush3.bf16.msra.mxu1 %v1371_v33 }
 0x116   :  { %v1577_v34 = vpop.f32.mrf.mxu0  ;;  %v1579_v35 = vpop.f32.mrf.mxu1 }
 0x118   :  { %v1581_v36 = vpop.f32.mrf.mxu0  ;;  %v1583_v37 = vpop.f32.mrf.mxu1 }
 0x11a   :  { %v1585_v38 = vpop.f32.mrf.mxu0  ;;  %v1587_v39 = vpop.f32.mrf.mxu1 }
 0x11c   :  { %v1589_v40 = vpop.f32.mrf.mxu0  ;;  %v1591_v41 = vpop.f32.mrf.mxu1 }
 0x136   :  { %v592_v42 = vpop.f32.mrf.mxu0  ;;  %v635_v43 = vpop.f32.mrf.mxu1 }
 0x137   :  { %v1147_v44 = vmul.f32 -1.442695, %v592_v42  ;;  %v1149_v45 = vmul.f32 -1.442695, %v635_v43 }
 0x138   :  { %v594_v46 = vpop.f32.mrf.mxu0  ;;  %v637_v47 = vpop.f32.mrf.mxu1 }
 0x139   :  { %1372 = vpow2.f32 %v1147_v44  ;;  %v1148_v48 = vmul.f32 -1.442695, %v594_v46  ;;  %v1150_v49 = vmul.f32 -1.442695, %v637_v47 }
 0x13a   :  { %1374 = vpow2.f32 %v1149_v45  ;;  %v596_v50 = vpop.f32.mrf.mxu0  ;;  %v639_v51 = vpop.f32.mrf.mxu1 }
 0x13b   :  { %1376 = vpow2.f32 %v1148_v48  ;;  %v1151_v52 = vmul.f32 -1.442695, %v596_v50  ;;  %v1153_v53 = vmul.f32 -1.442695, %v639_v51 }
 0x13c   :  { %1378 = vpow2.f32 %v1150_v49  ;;  %v598_v54 = vpop.f32.mrf.mxu0  ;;  %v641_v55 = vpop.f32.mrf.mxu1 }
 0x13d   :  { %1380 = vpow2.f32 %v1151_v52  ;;  %v1152_v56 = vmul.f32 -1.442695, %v598_v54  ;;  %v1154_v57 = vmul.f32 -1.442695, %v641_v55 }
 0x13e   :  { %1382 = vpow2.f32 %v1153_v53 }
 0x13f   :  { %1384 = vpow2.f32 %v1152_v56 }
 0x140   :  { %1386 = vpow2.f32 %v1154_v57 }
 0x146   :  { %v1373_v58 = vpop.eup %1372 }
 0x147   :  { %v1375_v59 = vpop.eup %1374  ;;  %v668_v60 = vadd.f32 1.0, %v1373_v58 }
 0x148   :  { %v1377_v61 = vpop.eup %1376  ;;  %v670_v62 = vadd.f32 1.0, %v1375_v59 }
 0x149   :  { %v1379_v63 = vpop.eup %1378  ;;  %1388 = vrcp.f32 %v668_v60  ;;  %v669_v0 = vadd.f32 1.0, %v1377_v61 }
 0x14a   :  { %v1381_v1 = vpop.eup %1380  ;;  %1390 = vrcp.f32 %v670_v62  ;;  %v671_v2 = vadd.f32 1.0, %v1379_v63 }
 0x14b   :  { %v1383_v3 = vpop.eup %1382  ;;  %1392 = vrcp.f32 %v669_v0  ;;  %v672_v4 = vadd.f32 1.0, %v1381_v1 }
 0x14c   :  { %v1385_v5 = vpop.eup %1384  ;;  %1394 = vrcp.f32 %v671_v2  ;;  %v674_v6 = vadd.f32 1.0, %v1383_v3 }
 0x14d   :  { %v1387_v7 = vpop.eup %1386  ;;  %1396 = vrcp.f32 %v672_v4  ;;  %v673_v8 = vadd.f32 1.0, %v1385_v5 }
 0x14e   :  { %1398 = vrcp.f32 %v674_v6  ;;  %v675_v9 = vadd.f32 1.0, %v1387_v7 }
 0x14f   :  { %1400 = vrcp.f32 %v673_v8 }
 0x150   :  { %1402 = vrcp.f32 %v675_v9 }
 0x156   :  { %v1389_v10 = vpop.eup %1388 }
 0x157   :  { %v1391_v11 = vpop.eup %1390  ;;  %v692_v19 = vmul.f32 %v1389_v10, %v592_v42 }
 0x158   :  { %v1393_v12 = vpop.eup %1392  ;;  %v694_v23 = vmul.f32 %v1391_v11, %v635_v43 }
 0x159   :  { %v1395_v13 = vpop.eup %1394  ;;  %v693_v16 = vmul.f32 %v1393_v12, %v594_v46  ;;  %v700_v30 = vmul.f32 %v692_v19, %v1577_v34 }
 0x15a   :  { %v1397_v14 = vpop.eup %1396  ;;  %v695_v20 = vmul.f32 %v1395_v13, %v637_v47  ;;  %v702_v33 = vmul.f32 %v694_v23, %v1579_v35 }
 0x15b   :  { %v1399_v15 = vpop.eup %1398  ;;  %v696_v17 = vmul.f32 %v1397_v14, %v596_v50  ;;  %v701_v27 = vmul.f32 %v693_v16, %v1581_v36 }
 0x15c   :  { %v1401_v18 = vpop.eup %1400  ;;  %v698_v21 = vmul.f32 %v1399_v15, %v639_v51  ;;  %v703_v31 = vmul.f32 %v695_v20, %v1583_v37 }
 0x15d   :  { %v1403_v22 = vpop.eup %1402  ;;  %v697_v24 = vmul.f32 %v1401_v18, %v598_v54  ;;  %v704_v25 = vmul.f32 %v696_v17, %v1585_v38 }
 0x15e   :  { %v699_v26 = vmul.f32 %v1403_v22, %v641_v55  ;;  %v706_v28 = vmul.f32 %v698_v21, %v1587_v39 }
 0x15f   :  { %v705_v29 = vmul.f32 %v697_v24, %v1589_v40  ;;  %v708_v43 = vpack.c.bf16 %v704_v25, %v700_v30 }
 0x160   :  { %v707_v32 = vmul.f32 %v699_v26, %v1591_v41  ;;  %v710_v45 = vpack.c.bf16 %v706_v28, %v702_v33 }
 0x161   :  { %v709_v42 = vpack.c.bf16 %v705_v29, %v701_v27 }
 0x162   :  { %v711_v44 = vpack.c.bf16 %v707_v32, %v703_v31 }
 0x163   :  { %1002 = vmatprep.mubr.bf16.mxu0 %v709_v42 }
 0x164   :  { %1043 = vmatprep.mubr.bf16.mxu1 %v711_v44  ;;  %1003 = vmatmul.mubr.bf16.vlgmr.msra.gmra.mxu0 %v708_v43 }
 0x165   :  { %1044 = vmatmul.mubr.bf16.vlgmr.msra.gmra.mxu1 %v710_v45 }
 0x224   :  { %v1203_v36 = vpop.f32.mrf.mxu0 }
 0x225   :  { %v1225_v38 = vpop.f32.mrf.mxu1 }
 0x226   :  { %v1204_v39 = vpop.f32.mrf.mxu0 }
 0x227   :  { %v1205_v40 = vadd.f32 %v1204_v39, %v1203_v36  ;;  %v1226_v46 = vpop.f32.mrf.mxu1 }
 0x228   :  { %v1227_v34 = vadd.f32 %v1226_v46, %v1225_v38  ;;  %v1206_v47 = vpop.f32.mrf.mxu0 }
 0x229   :  { %v1228_v37 = vpop.f32.mrf.mxu1 }
 0x22a   :  { %v1046_v48 = vadd.f32 %v1227_v34, %v1205_v40  ;;  %v1207_v41 = vpop.f32.mrf.mxu0 }
 0x22b   :  { %v1208_v35 = vadd.f32 %v1207_v41, %v1206_v47  ;;  %v1229_v49 = vpop.f32.mrf.mxu1 }
 0x22c   :  { %1061 = vst [vmem:[#allocation11] sm:$0xff] %v1046_v48  ;;  %v1230_v50 = vadd.f32 %v1229_v49, %v1228_v37 }
 0x22e   :  { %v1049_v51 = vadd.f32 %v1230_v50, %v1208_v35 }
 0x230   :  { %1062 = vst [vmem:[#allocation11 + $0x8] sm:$0xff] %v1049_v51 }
 0x231   :  { %1495 = shalt.err (!%p1492_p10)
}
 0x232   :  { %s1522_s12 = smov 128   ;;  %s1523_s13 = smov 8  }
 0x233   :  { %1074 = dma.vmem_to_hbm [thread:$0]  %s1069_s3, 256, %s1608_s4, [#allocation5], %s1522_s12, %s1522_s12, %s1523_s13  }
 0x234   :  { %1510 = dma.done.wait [#allocation5], 256  }
 0x235   :  { %1511 = vsyncadd [#allocation5], 4294967040 }
 0x236   :  { %1078 = vsyncpa [#allocation4], 1 }
 0x237   :  { %1079 = vsyncpa [#allocation7], 1 }
 0x238   :  { %1080 = vsyncpa [#allocation10], 1 }
 0x239   :  { %1081 = vsyncpa [#allocation5], 1 }

</bundles_post_ra>
